<compile_context>
chip_gen: v6e
topology: v6e:2x2x1
jax: 0.10.0
libtpu: 0.0.40
codegen_flags: <defaults>
</compile_context>

<pallas_src>
import numpy as np
import jax
import jax.numpy as jnp
from jax.experimental import pallas as pl
from jax.experimental.pallas import tpu as pltpu


def _bilinear_matrix(out_size, in_size):
    """1-D bilinear interpolation matrix (PyTorch F.interpolate, align_corners=False)."""
    scale = in_size / out_size
    i = np.arange(out_size, dtype=np.float64)
    src = np.maximum((i + 0.5) * scale - 0.5, 0.0)
    i0 = np.minimum(np.floor(src).astype(np.int64), in_size - 1)
    i1 = np.minimum(i0 + 1, in_size - 1)
    frac = (src - i0).astype(np.float32)
    M = np.zeros((out_size, in_size), dtype=np.float32)
    M[np.arange(out_size), i0] += 1.0 - frac
    M[np.arange(out_size), i1] += frac
    return M


def _shifted(M, d):
    """Row-shifted copy: out[i, :] = M[i + d, :], zero where i + d is out of range."""
    out = np.zeros_like(M)
    n = M.shape[0]
    lo, hi = max(0, -d), min(n, n - d)
    out[lo:hi, :] = M[lo + d:hi + d, :]
    return out


def _cnn_fused_kernel(x_ref, op1_ref, aop_ref, bias_ref, fop_ref, fcb_ref,
                      prob_ref, cls_ref):
    f32 = jnp.float32
    cw = op1_ref.shape[1] // 3          # Cout * Wo lanes per kh block
    nsel = fop_ref.shape[1]

    # Stage 1: width upsample fused with the conv's (ci, kw) taps.
    #   (H, Cin*W) @ (Cin*W, 3*Cout*Wo) -> (H, [kh, co, wo])
    z = jnp.dot(x_ref[...], op1_ref[...],
                preferred_element_type=f32).astype(jnp.bfloat16)

    # Move the kh blocks from lanes to sublanes: 3 lane-aligned static slices,
    # sublane-aligned concat (H is a multiple of the bf16 sublane tile).
    z3 = jnp.concatenate([z[:, i * cw:(i + 1) * cw] for i in range(3)], axis=0)

    # Stage 2: height upsample fused with the conv's kh taps.
    #   (Ho, 3*H) @ (3*H, Cout*Wo) -> (Ho, [co, wo])
    y = jnp.dot(aop_ref[...], z3, preferred_element_type=f32)

    # Conv bias + ReLU.
    y = jnp.maximum(y + bias_ref[...], 0.0)

    # Global average pool + FC + class_ids selection, fused:
    # row-sum over ho, then contract (co, wo) with fc_w[class_ids]/ (Ho*Wo).
    ys = jnp.sum(y, axis=0, keepdims=True)                       # (1, Cout*Wo)
    sel = jnp.dot(ys, fop_ref[...],
                  preferred_element_type=f32) + fcb_ref[...]     # (1, nsel)

    # Softmax over the SELECTED logits (matches torch: softmax(class_out[:, ids])).
    m = jnp.max(sel, axis=-1, keepdims=True)
    e = jnp.exp(sel - m)
    prob = e / jnp.sum(e, axis=-1, keepdims=True)

    cls_ref[0] = jnp.broadcast_to(sel, (cls_ref.shape[1], nsel))
    prob_ref[0] = jnp.broadcast_to(prob, (prob_ref.shape[1], nsel))


def make_forward(conv_w, conv_b, fc_w, fc_b, class_ids):
    """Returns forward(x) -> (prob_out, class_select), matching the PyTorch
    CNN(model, class_ids).forward with the synthetic conv/GAP/linear model."""
    conv_w = np.asarray(conv_w, np.float32)       # (Cout, Cin, 3, 3)
    conv_b = np.asarray(conv_b, np.float32)       # (Cout,)
    fc_w = np.asarray(fc_w, np.float32)           # (ncls, Cout)
    fc_b = np.asarray(fc_b, np.float32)           # (ncls,)
    class_ids = [int(i) for i in class_ids]

    c_out, c_in = conv_w.shape[0], conv_w.shape[1]
    nsel = len(class_ids)

    def forward(x):
        n, c, h, w = x.shape
        assert c == c_in
        ho, wo = 4 * h, 4 * w
        hw = ho * wo

        # ---- trace-time constants (numpy; a few hundred KB total) ----
        a_mat = _bilinear_matrix(ho, h)                        # (Ho, H)
        b_mat = _bilinear_matrix(wo, w)                        # (Wo, W)

        # Width operator fused with the conv (ci, kw) taps + border zeros:
        #   op1[ci*W+w, kh*Cout*Wo + co*Wo + wo] = sum_kw conv_w[co,ci,kh,kw] * B[wo+kw-1, w]
        b_sh = np.stack([_shifted(b_mat, kw - 1) for kw in range(3)])   # (3, Wo, W)
        op1 = np.einsum('oikq,qpw->iwkop', conv_w, b_sh)
        op1 = op1.reshape(c_in * w, 3 * c_out * wo)

        # Height operator fused with the conv kh taps: aop[ho, kh*H+h] = A[ho+kh-1, h]
        aop = np.concatenate([_shifted(a_mat, kh - 1) for kh in range(3)], axis=1)

        # Conv bias broadcast over the (co, wo) lane axis.
        bias_lane = np.repeat(conv_b, wo).reshape(1, c_out * wo)

        # GAP + FC + class_ids select fused: Fop[co*Wo+wo, j] = fc_w[ids[j], co] / (Ho*Wo)
        fc_sel = fc_w[class_ids, :]                            # (nsel, Cout)
        fop = np.repeat(fc_sel.T, wo, axis=0) / float(hw)      # (Cout*Wo, nsel)
        fcb_sel = fc_b[class_ids].reshape(1, nsel)

        # Input rearranged outside the kernel (tiny layout plumbing):
        # rows = (n, h), lanes = (ci, w)  -> matches Op1's contraction index.
        xr = jnp.transpose(x, (0, 2, 1, 3)).reshape(n * h, c * w).astype(jnp.bfloat16)

        out_pad = 8   # sublane padding for the tiny per-sample output tile

        prob_p, cls_p = pl.pallas_call(
            _cnn_fused_kernel,
            out_shape=(jax.ShapeDtypeStruct((n, out_pad, nsel), jnp.float32),
                       jax.ShapeDtypeStruct((n, out_pad, nsel), jnp.float32)),
            grid=(n,),
            in_specs=[
                pl.BlockSpec((h, c * w), lambda i: (i, 0)),            # per-sample x
                pl.BlockSpec((c * w, 3 * c_out * wo), lambda i: (0, 0)),  # Op1 (resident)
                pl.BlockSpec((ho, 3 * h), lambda i: (0, 0)),           # Aop (resident)
                pl.BlockSpec((1, c_out * wo), lambda i: (0, 0)),       # conv bias
                pl.BlockSpec((c_out * wo, nsel), lambda i: (0, 0)),    # GAP+FC+select
                pl.BlockSpec((1, nsel), lambda i: (0, 0)),             # FC bias (selected)
            ],
            out_specs=(pl.BlockSpec((1, out_pad, nsel), lambda i: (i, 0, 0)),
                       pl.BlockSpec((1, out_pad, nsel), lambda i: (i, 0, 0))),
            compiler_params=pltpu.CompilerParams(
                dimension_semantics=("parallel",)),
        )(xr,
          jnp.asarray(op1, jnp.bfloat16),
          jnp.asarray(aop, jnp.bfloat16),
          jnp.asarray(bias_lane, jnp.float32),
          jnp.asarray(fop, jnp.float32),
          jnp.asarray(fcb_sel, jnp.float32))

        # (prob_out, class_select) in PyTorch return order.
        return prob_p[:, 0, :], cls_p[:, 0, :]

    return forward


def _reference_forward(x, conv_w, conv_b, fc_w, fc_b, class_ids):
    """Pure-JAX f32 reference of the same forward pass (for a sanity check)."""
    n, c, h, w = x.shape
    ho, wo = 4 * h, 4 * w
    A = jnp.asarray(_bilinear_matrix(ho, h))
    B = jnp.asarray(_bilinear_matrix(wo, w))
    xu = jnp.einsum('oh,nchw,pw->ncop', A, x, B)
    y = jax.lax.conv_general_dilated(xu, conv_w, (1, 1), 'SAME',
                                     dimension_numbers=('NCHW', 'OIHW', 'NCHW'))
    y = jax.nn.relu(y + conv_b.reshape(1, -1, 1, 1))
    pooled = jnp.mean(y, axis=(2, 3))
    logits = pooled @ fc_w.T + fc_b
    sel = logits[:, list(class_ids)]
    return jax.nn.softmax(sel, axis=1), sel


# -----------------------------------------------------------------------------
if __name__ == "__main__":
    key = jax.random.PRNGKey(0)
    k1, k2, k3, k4, k5 = jax.random.split(key, 5)

    N, Cin, H, W = 2, 4, 16, 16
    Cmid, ncls = 8, 10
    class_ids = (0, 3, 7)

    x = jax.random.normal(k1, (N, Cin, H, W), dtype=jnp.float32)
    conv_w = 0.1 * jax.random.normal(k2, (Cmid, Cin, 3, 3), dtype=jnp.float32)
    conv_b = 0.1 * jax.random.normal(k3, (Cmid,), dtype=jnp.float32)
    fc_w = 0.1 * jax.random.normal(k4, (ncls, Cmid), dtype=jnp.float32)
    fc_b = 0.1 * jax.random.normal(k5, (ncls,), dtype=jnp.float32)

    forward = make_forward(conv_w, conv_b, fc_w, fc_b, class_ids)
    prob_out, class_select = jax.jit(forward)(x)
    jax.block_until_ready((prob_out, class_select))

    assert prob_out.shape == (N, len(class_ids))
    assert class_select.shape == (N, len(class_ids))
    assert bool(jnp.allclose(jnp.sum(prob_out, axis=1), 1.0, atol=1e-5))

    # Loose-tolerance check against the f32 reference (kernel uses bf16 MXU operands).
    ref_prob, ref_sel = _reference_forward(x, conv_w, conv_b, fc_w, fc_b, class_ids)
    assert bool(jnp.allclose(prob_out, ref_prob, atol=5e-2))
    assert bool(jnp.allclose(class_select, ref_sel, atol=5e-2))

    print("KERNEL_OK")
</pallas_src>

<mosaic_0001>
module attributes {stable_mosaic.version = 11 : i64} {
  func.func @_cnn_fused_kernel(%arg0: i32, %arg1: memref<16x64xbf16, #tpu.memory_space<vmem>>, %arg2: memref<64x1536xbf16, #tpu.memory_space<vmem>>, %arg3: memref<64x48xbf16, #tpu.memory_space<vmem>>, %arg4: memref<1x512xf32, #tpu.memory_space<vmem>>, %arg5: memref<512x3xf32, #tpu.memory_space<vmem>>, %arg6: memref<1x3xf32, #tpu.memory_space<vmem>>, %arg7: memref<1x8x3xf32, #tpu.memory_space<vmem>>, %arg8: memref<1x8x3xf32, #tpu.memory_space<vmem>>) attributes {dimension_semantics = [#tpu.dimension_semantics<parallel>], iteration_bounds = array<i64: 2>, scalar_prefetch = 0 : i64, scratch_operands = 0 : i64, tpu.core_type = #tpu.core_type<tc>, window_params = [{transform_indices = @transform_0, window_bounds = array<i64: 16, 64>}, {pipeline_mode = #tpu.pipeline_mode<synchronous>, transform_indices = @transform_1, window_bounds = array<i64: 64, 1536>}, {pipeline_mode = #tpu.pipeline_mode<synchronous>, transform_indices = @transform_2, window_bounds = array<i64: 64, 48>}, {pipeline_mode = #tpu.pipeline_mode<synchronous>, transform_indices = @transform_3, window_bounds = array<i64: 1, 512>}, {pipeline_mode = #tpu.pipeline_mode<synchronous>, transform_indices = @transform_4, window_bounds = array<i64: 512, 3>}, {pipeline_mode = #tpu.pipeline_mode<synchronous>, transform_indices = @transform_5, window_bounds = array<i64: 1, 3>}, {transform_indices = @transform_6, window_bounds = array<i64: 1, 8, 3>}, {transform_indices = @transform_7, window_bounds = array<i64: 1, 8, 3>}]} {
    %c0 = arith.constant 0 : index
    %c0_0 = arith.constant 0 : index
    %0 = vector.load %arg1[%c0, %c0_0] : memref<16x64xbf16, #tpu.memory_space<vmem>>, vector<16x64xbf16>
    %c0_1 = arith.constant 0 : index
    %c0_2 = arith.constant 0 : index
    %1 = vector.load %arg2[%c0_1, %c0_2] : memref<64x1536xbf16, #tpu.memory_space<vmem>>, vector<64x1536xbf16>
    %cst = arith.constant dense<0.000000e+00> : vector<16x1536xf32>
    %2 = tpu.matmul %0, %1, %cst {dimension_numbers = #tpu.dot_dimension_numbers<[1], [0], [0], [1], [0, 0, 1, 1], [], []>} : vector<16x64xbf16>, vector<64x1536xbf16>, vector<16x1536xf32> -> vector<16x1536xf32>
    %3 = arith.truncf %2 : vector<16x1536xf32> to vector<16x1536xbf16>
    %4 = vector.extract_strided_slice %3 {offsets = [0, 0], sizes = [16, 512], strides = [1, 1]} : vector<16x1536xbf16> to vector<16x512xbf16>
    %5 = vector.extract_strided_slice %3 {offsets = [0, 512], sizes = [16, 512], strides = [1, 1]} : vector<16x1536xbf16> to vector<16x512xbf16>
    %6 = vector.extract_strided_slice %3 {offsets = [0, 1024], sizes = [16, 512], strides = [1, 1]} : vector<16x1536xbf16> to vector<16x512xbf16>
    %7 = tpu.concatenate %4, %5, %6 in 0 : vector<16x512xbf16>, vector<16x512xbf16>, vector<16x512xbf16> -> vector<48x512xbf16>
    %c0_3 = arith.constant 0 : index
    %c0_4 = arith.constant 0 : index
    %8 = vector.load %arg3[%c0_3, %c0_4] : memref<64x48xbf16, #tpu.memory_space<vmem>>, vector<64x48xbf16>
    %cst_5 = arith.constant dense<0.000000e+00> : vector<64x512xf32>
    %9 = tpu.matmul %8, %7, %cst_5 {dimension_numbers = #tpu.dot_dimension_numbers<[1], [0], [0], [1], [0, 0, 1, 1], [], []>} : vector<64x48xbf16>, vector<48x512xbf16>, vector<64x512xf32> -> vector<64x512xf32>
    %c0_6 = arith.constant 0 : index
    %c0_7 = arith.constant 0 : index
    %10 = vector.load %arg4[%c0_6, %c0_7] : memref<1x512xf32, #tpu.memory_space<vmem>>, vector<1x512xf32>
    %11 = vector.broadcast %10 : vector<1x512xf32> to vector<64x512xf32>
    %12 = arith.addf %9, %11 : vector<64x512xf32>
    %cst_8 = arith.constant 0.000000e+00 : f32
    %13 = vector.broadcast %cst_8 : f32 to vector<64x512xf32>
    %14 = arith.maximumf %12, %13 : vector<64x512xf32>
    %cst_9 = arith.constant dense<0.000000e+00> : vector<512xf32>
    %15 = vector.multi_reduction <add>, %14, %cst_9 [0] : vector<64x512xf32> to vector<512xf32>
    %16 = vector.shape_cast %15 : vector<512xf32> to vector<1x512xf32>
    %c0_10 = arith.constant 0 : index
    %c0_11 = arith.constant 0 : index
    %17 = vector.load %arg5[%c0_10, %c0_11] : memref<512x3xf32, #tpu.memory_space<vmem>>, vector<512x3xf32>
    %cst_12 = arith.constant dense<0.000000e+00> : vector<1x3xf32>
    %18 = tpu.matmul %16, %17, %cst_12 {dimension_numbers = #tpu.dot_dimension_numbers<[1], [0], [0], [1], [0, 0, 1, 1], [], []>} : vector<1x512xf32>, vector<512x3xf32>, vector<1x3xf32> -> vector<1x3xf32>
    %c0_13 = arith.constant 0 : index
    %c0_14 = arith.constant 0 : index
    %19 = vector.load %arg6[%c0_13, %c0_14] : memref<1x3xf32, #tpu.memory_space<vmem>>, vector<1x3xf32>
    %20 = arith.addf %18, %19 : vector<1x3xf32>
    %cst_15 = arith.constant dense<0xFF800000> : vector<1xf32>
    %21 = vector.multi_reduction <maximumf>, %20, %cst_15 [1] : vector<1x3xf32> to vector<1xf32>
    %22 = vector.shape_cast %21 : vector<1xf32> to vector<1x1xf32>
    %23 = vector.broadcast %22 : vector<1x1xf32> to vector<1x3xf32>
    %24 = arith.subf %20, %23 : vector<1x3xf32>
    %25 = math.exp %24 : vector<1x3xf32>
    %cst_16 = arith.constant dense<0.000000e+00> : vector<1xf32>
    %26 = vector.multi_reduction <add>, %25, %cst_16 [1] : vector<1x3xf32> to vector<1xf32>
    %27 = vector.shape_cast %26 : vector<1xf32> to vector<1x1xf32>
    %28 = vector.broadcast %27 : vector<1x1xf32> to vector<1x3xf32>
    %29 = arith.divf %25, %28 : vector<1x3xf32>
    %30 = vector.shape_cast %20 : vector<1x3xf32> to vector<1x3xf32>
    %31 = vector.broadcast %30 : vector<1x3xf32> to vector<8x3xf32>
    %c0_17 = arith.constant 0 : index
    %c0_18 = arith.constant 0 : index
    %c0_19 = arith.constant 0 : index
    %32 = vector.load %arg8[%c0_17, %c0_18, %c0_19] : memref<1x8x3xf32, #tpu.memory_space<vmem>>, vector<1x8x3xf32>
    %33 = vector.shape_cast %32 : vector<1x8x3xf32> to vector<8x3xf32>
    %34 = vector.shape_cast %31 : vector<8x3xf32> to vector<1x8x3xf32>
    tpu.vector_store %arg8[%c0_17, %c0_18, %c0_19], %34 {strides = array<i32>} : memref<1x8x3xf32, #tpu.memory_space<vmem>>, vector<1x8x3xf32>,
    %35 = vector.shape_cast %29 : vector<1x3xf32> to vector<1x3xf32>
    %36 = vector.broadcast %35 : vector<1x3xf32> to vector<8x3xf32>
    %c0_20 = arith.constant 0 : index
    %c0_21 = arith.constant 0 : index
    %c0_22 = arith.constant 0 : index
    %37 = vector.load %arg7[%c0_20, %c0_21, %c0_22] : memref<1x8x3xf32, #tpu.memory_space<vmem>>, vector<1x8x3xf32>
    %38 = vector.shape_cast %37 : vector<1x8x3xf32> to vector<8x3xf32>
    %39 = vector.shape_cast %36 : vector<8x3xf32> to vector<1x8x3xf32>
    tpu.vector_store %arg7[%c0_20, %c0_21, %c0_22], %39 {strides = array<i32>} : memref<1x8x3xf32, #tpu.memory_space<vmem>>, vector<1x8x3xf32>,
    return
  }
  func.func @transform_0(%arg0: i32) -> (i32, i32) {
    %c0_i32 = arith.constant 0 : i32
    %c0_i32_0 = arith.constant 0 : i32
    return %arg0, %c0_i32 : i32, i32
  }
  func.func @transform_1(%arg0: i32) -> (i32, i32) {
    %c0_i32 = arith.constant 0 : i32
    %c0_i32_0 = arith.constant 0 : i32
    %c0_i32_1 = arith.constant 0 : i32
    return %c0_i32, %c0_i32_0 : i32, i32
  }
  func.func @transform_2(%arg0: i32) -> (i32, i32) {
    %c0_i32 = arith.constant 0 : i32
    %c0_i32_0 = arith.constant 0 : i32
    %c0_i32_1 = arith.constant 0 : i32
    return %c0_i32, %c0_i32_0 : i32, i32
  }
  func.func @transform_3(%arg0: i32) -> (i32, i32) {
    %c0_i32 = arith.constant 0 : i32
    %c0_i32_0 = arith.constant 0 : i32
    %c0_i32_1 = arith.constant 0 : i32
    return %c0_i32, %c0_i32_0 : i32, i32
  }
  func.func @transform_4(%arg0: i32) -> (i32, i32) {
    %c0_i32 = arith.constant 0 : i32
    %c0_i32_0 = arith.constant 0 : i32
    %c0_i32_1 = arith.constant 0 : i32
    return %c0_i32, %c0_i32_0 : i32, i32
  }
  func.func @transform_5(%arg0: i32) -> (i32, i32) {
    %c0_i32 = arith.constant 0 : i32
    %c0_i32_0 = arith.constant 0 : i32
    %c0_i32_1 = arith.constant 0 : i32
    return %c0_i32, %c0_i32_0 : i32, i32
  }
  func.func @transform_6(%arg0: i32) -> (i32, i32, i32) {
    %c0_i32 = arith.constant 0 : i32
    %c0_i32_0 = arith.constant 0 : i32
    %c0_i32_1 = arith.constant 0 : i32
    return %arg0, %c0_i32, %c0_i32_0 : i32, i32, i32
  }
  func.func @transform_7(%arg0: i32) -> (i32, i32, i32) {
    %c0_i32 = arith.constant 0 : i32
    %c0_i32_0 = arith.constant 0 : i32
    %c0_i32_1 = arith.constant 0 : i32
    return %arg0, %c0_i32, %c0_i32_0 : i32, i32, i32
  }
}

</mosaic_0001>

<bundles_post_ra>
// kernel: forward.1
= control target key start
LH: loop header
LB: loop body
LE: loop exit
PB: predicated region body
PF: predicated region fallthrough
CT: control target
= control target key end

     0   :  { %13 = vsyncpa [#allocation3], 0  ;;  %s2198_s0 = inlined_call_operand.vmem [shape: bf16[32,64], index: 0, kind: input, shape index: {}]   ;;  %s2199_s1 = inlined_call_operand.vmem [shape: bf16[64,1536], index: 1, kind: input, shape index: {}]   ;;  %s2200_s2 = inlined_call_operand.hbm [shape: bf16[64,48], index: 2, kind: input, shape index: {}]   ;;  %s2201_s3 = inlined_call_operand.vmem [shape: f32[1,512], index: 3, kind: input, shape index: {}]   ;;  %s2202_s4 = inlined_call_operand.hbm [shape: f32[512,3], index: 4, kind: input, shape index: {}]   ;;  %s2203_s5 = inlined_call_operand.vmem [shape: f32[1,3], index: 5, kind: input, shape index: {}]   ;;  %s2204_s6 = inlined_call_operand.vmem [shape: f32[2,8,3], index: 6, kind: output, shape index: {0}]   ;;  %s2205_s7 = inlined_call_operand.vmem [shape: f32[2,8,3], index: 7, kind: output, shape index: {1}]  }
   0x1   :  { %14 = vsyncpa [#allocation5], 0  ;;  %s1899_s24 = smov 0  }
   0x2 LB: > { %s1852_s25 = smov [#allocation2]   ;;  %s1905_s27 = sadd.s32 4294967295, %s1850_s24   ;;  %s1850_s24 = sphi %s1899_s24, %s20_s24  }
   0x3   : > { %s223_s26 = sshll.u32 %s1852_s25, 4  ;;  %p1519_p0 = scmp.ge.s32.totalorder %s1850_s24, 1  ;;  %s224_s26 = int_to_ptr.vmem [resolvable:$true] %s223_s26 }
   0x4   : > { %p208_p1 = scmp.lt.s32.totalorder %s1850_s24, 3  ;;  %p1684_p3 = scmp.eq.s32.totalorder %s1905_s27, 0 }
   0x5   : > { %s1853_s29 = smov [#allocation4]   ;;  %s1795_s9 = scalar_lea.vmem %s224_s26, 512 }
   0x6   : > { %p1909_p2 = pnand %p1519_p0, %p208_p1  ;;  %s239_s30 = sshll.u32 %s1853_s29, 4  ;;  %s240_s30 = int_to_ptr.vmem [resolvable:$true] %s239_s30 }
   0x7   : > { %p1796_p7 = scmp.ne.s32.totalorder %s224_s26, %s1795_s9  ;;  %p1803_p10 = scmp.lt.s32.totalorder %s224_s26, %s224_s26 }
   0x8   : > { %p1677_p4 = pneg %p1909_p2  ;;  %p1804_p11 = scmp.lt.s32.totalorder %s1795_s9, %s1795_s9 }
   0xa   : > { %p1918_p5 = pnand %p1684_p3, %p1677_p4  ;;  %p1805_p12 = por %p1804_p11, %p1803_p10 }
   0xc   : > { %p1786_p6 = pneg %p1918_p5 }
   0xe   : > { %p1798_p8 = pnand %p1796_p7, %p1786_p6 }
  0x10   : > { %p1799_p9 = pneg %p1798_p8 }
  0x12   : > { %p1806_p13 = pnand %p1805_p12, %p1799_p9 }
  0x14   : > { %1809 = shalt.err (!%p1806_p13)
}
  0x15   : > { %s1854_s10 = smov 64   ;;  %s1855_s11 = smov 4  }
  0x16   : > { %1680 = dma.hbm_to_vmem [thread:$0]  (!%p1918_p5), %s2200_s2, 512, %s224_s26, [#allocation3], %s1854_s10, %s1854_s10, %s1855_s11  }
  0x17   : > { %s1821_s14 = scalar_lea.vmem %s240_s30, 8192  ;;  %p1829_p7 = scmp.lt.s32.totalorder %s240_s30, %s240_s30 }
  0x18   : > { %p1822_p0 = scmp.ne.s32.totalorder %s240_s30, %s1821_s14  ;;  %p1830_p8 = scmp.lt.s32.totalorder %s1821_s14, %s1821_s14 }
  0x1a   : > { %p1824_p1 = pnand %p1822_p0, %p1786_p6  ;;  %p1831_p10 = por %p1830_p8, %p1829_p7 }
  0x1c   : > { %p1825_p4 = pneg %p1824_p1 }
  0x1e   : > { %p1832_p9 = pnand %p1831_p10, %p1825_p4 }
  0x20   : > { %1835 = shalt.err (!%p1832_p9)
}
  0x21   : > { %s1856_s15 = smov 128   ;;  %s1857_s16 = smov 8  }
  0x22   : > { %1683 = dma.hbm_to_vmem [thread:$0]  (!%p1918_p5), %s2202_s4, 8192, %s240_s30, [#allocation5], %s1856_s15, %s1856_s15, %s1857_s16  }
  0x23   : > { %267 = sbr.rel (%p1909_p2) target bundleno = 1064 (0x428), region = 44 }
  0x28   : > { %1841 = dma.done.wait (%p1684_p3), [#allocation3], 512  }
  0x29   : > { %1843 = vsyncadd (%p1684_p3), [#allocation3], 4294966784 }
  0x2a   : > { %1845 = dma.done.wait (%p1684_p3), [#allocation5], 8192  }
  0x2b   : > { %1847 = vsyncadd (%p1684_p3), [#allocation5], 4294959104  ;;  %v1858_v0 = vmov 0   ;;  %s1526_s19 = sshll.u32 %s1905_s27, 1  ;;  %v1703_v1 = vld [vmem:[%s2199_s1 + $0x124] ss:$48 sps:$4 sm:$0xff]  }
  0x2c   : > { %652 = vmatprep.mubr.bf16.mxu0 %v1858_v0  ;;  %695 = vmatprep.mubr.bf16.mxu1 %v1858_v0  ;;  %p307_p2 = scmp.lt.s32.totalorder %s1526_s19, 3  ;;  %v1705_v2 = vld [vmem:[%s2199_s1 + $0x12c] ss:$48 sps:$4 sm:$0xff]   ;;  %v1707_v3 = vld [vmem:[%s2199_s1 + $0x120] ss:$48 sps:$4 sm:$0xff]   ;;  %vm616_vm0 = vcmask 523264  }
  0x2d   : > { %628 = vmatprep.subr.bf16.mxu0 %v1703_v1  ;;  %v1708_v4 = vld [vmem:[%s2199_s1 + $0x128] ss:$48 sps:$4 sm:$0xff]   ;;  %671 = vmatprep.subr.bf16.mxu1 %v1705_v2  ;;  %v1709_v5 = vld [vmem:[%s2199_s1 + $0xc4] ss:$48 sps:$4 sm:$0xff]   ;;  %v1711_v6 = vld [vmem:[%s2199_s1 + $0xcc] ss:$48 sps:$4 sm:$0xff]  }
  0x2e   : > { %s2209_s19 = smov (!%p307_p2, %s1526_s19), 3  ;;  %629 = vmatpush1.bf16.msra.mxu0 %v1707_v3  ;;  %672 = vmatpush1.bf16.msra.mxu1 %v1708_v4  ;;  %v1713_v7 = vld [vmem:[%s2199_s1 + $0xc0] ss:$48 sps:$4 sm:$0xff]   ;;  %v1714_v8 = vld [vmem:[%s2199_s1 + $0xc8] ss:$48 sps:$4 sm:$0xff]   ;;  %vm940_vm1 = vcmask 392192  }
  0x2f   : > { %630 = vmatprep.subr.bf16.mxu0 %v1709_v5  ;;  %673 = vmatprep.subr.bf16.mxu1 %v1711_v6  ;;  %v1715_v9 = vld [vmem:[%s2199_s1 + $0x64] ss:$48 sps:$4 sm:$0xff]   ;;  %s1527_s17 = sshll.u32 %s2209_s19, 2  ;;  %v1717_v10 = vld [vmem:[%s2199_s1 + $0x6c] ss:$48 sps:$4 sm:$0xff]   ;;  %p312_p3 = scmp.lt.s32.totalorder %s1905_s27, 1 }
  0x30   : > { %v1719_v11 = vld [vmem:[%s2199_s1 + $0x60] ss:$48 sps:$4 sm:$0xff]   ;;  %v1720_v12 = vld [vmem:[%s2199_s1 + $0x68] ss:$48 sps:$4 sm:$0xff]   ;;  %v1721_v13 = vld [vmem:[%s2199_s1 + $0x4] ss:$48 sps:$4 sm:$0xff]   ;;  %s310_s9 = scalar_lea.vmem %s2198_s0, %s1527_s17 }
  0x31   : > { %v1723_v14 = vld [vmem:[%s2199_s1 + $0xc] ss:$48 sps:$4 sm:$0xff]   ;;  %v1725_v15 = vld [vmem:[%s2199_s1] ss:$48 sps:$4 sm:$0xff]   ;;  %v1726_v16 = vld [vmem:[%s2199_s1 + $0x8] ss:$48 sps:$4 sm:$0xff]  }
  0x32   : > { %631 = vmatpush1.bf16.msra.mxu0 %v1713_v7  ;;  %674 = vmatpush1.bf16.msra.mxu1 %v1714_v8  ;;  %v1730_v17 = vld [vmem:[%s2199_s1 + $0x134] ss:$48 sps:$4 sm:$0xff]   ;;  %v1733_v18 = vld [vmem:[%s2199_s1 + $0x13c] ss:$48 sps:$4 sm:$0xff]   ;;  %v1728_v20 = vld [vmem:[%s2199_s1 + $0x130] ss:$48 sps:$4 sm:$0xff]  }
  0x33   : > { %632 = vmatprep.subr.bf16.mxu0 %v1715_v9  ;;  %675 = vmatprep.subr.bf16.mxu1 %v1717_v10  ;;  %v2010_v19 = vld [vmem:[%s310_s9] sm:$0xff]   ;;  %v1731_v21 = vld [vmem:[%s2199_s1 + $0x138] ss:$48 sps:$4 sm:$0xff]   ;;  %v1739_v23 = vld [vmem:[%s2199_s1 + $0xdc] ss:$48 sps:$4 sm:$0xff]   ;;  %s2211_s27 = smov (!%p312_p3, %s1905_s27), 1 }
  0x34   : > { %v1736_v22 = vld [vmem:[%s2199_s1 + $0xd4] ss:$48 sps:$4 sm:$0xff]   ;;  %v1734_v24 = vld [vmem:[%s2199_s1 + $0xd0] ss:$48 sps:$4 sm:$0xff]   ;;  %v1737_v25 = vld [vmem:[%s2199_s1 + $0xd8] ss:$48 sps:$4 sm:$0xff]  }
  0x35   : > { %v1742_v26 = vld [vmem:[%s2199_s1 + $0x74] ss:$48 sps:$4 sm:$0xff]   ;;  %v1745_v27 = vld [vmem:[%s2199_s1 + $0x7c] ss:$48 sps:$4 sm:$0xff]   ;;  %v1740_v28 = vld [vmem:[%s2199_s1 + $0x70] ss:$48 sps:$4 sm:$0xff]  }
  0x36   : > { %633 = vmatpush1.bf16.msra.mxu0 %v1719_v11  ;;  %676 = vmatpush1.bf16.msra.mxu1 %v1720_v12  ;;  %v1743_v29 = vld [vmem:[%s2199_s1 + $0x78] ss:$48 sps:$4 sm:$0xff]   ;;  %v1748_v30 = vld [vmem:[%s2199_s1 + $0x14] ss:$48 sps:$4 sm:$0xff]   ;;  %v1751_v31 = vld [vmem:[%s2199_s1 + $0x1c] ss:$48 sps:$4 sm:$0xff]  }
  0x37   : > { %634 = vmatprep.subr.bf16.mxu0 %v1721_v13  ;;  %677 = vmatprep.subr.bf16.mxu1 %v1723_v14  ;;  %v1746_v32 = vld [vmem:[%s2199_s1 + $0x10] ss:$48 sps:$4 sm:$0xff]   ;;  %v1749_v33 = vld [vmem:[%s2199_s1 + $0x18] ss:$48 sps:$4 sm:$0xff]   ;;  %v1754_v34 = vld [vmem:[%s2199_s1 + $0x144] ss:$48 sps:$4 sm:$0xff]  }
  0x38   : > { %v1757_v35 = vld [vmem:[%s2199_s1 + $0x14c] ss:$48 sps:$4 sm:$0xff]   ;;  %v1752_v36 = vld [vmem:[%s2199_s1 + $0x140] ss:$48 sps:$4 sm:$0xff]   ;;  %v1755_v37 = vld [vmem:[%s2199_s1 + $0x148] ss:$48 sps:$4 sm:$0xff]  }
  0x39   : > { %v1760_v38 = vld [vmem:[%s2199_s1 + $0xe4] ss:$48 sps:$4 sm:$0xff]   ;;  %v1763_v39 = vld [vmem:[%s2199_s1 + $0xec] ss:$48 sps:$4 sm:$0xff]   ;;  %v1758_v40 = vld [vmem:[%s2199_s1 + $0xe0] ss:$48 sps:$4 sm:$0xff]  }
  0x3a   : > { %635 = vmatpush1.bf16.msra.mxu0 %v1725_v15  ;;  %678 = vmatpush1.bf16.msra.mxu1 %v1726_v16  ;;  %v1761_v41 = vld [vmem:[%s2199_s1 + $0xe8] ss:$48 sps:$4 sm:$0xff]   ;;  %v1766_v42 = vld [vmem:[%s2199_s1 + $0x84] ss:$48 sps:$4 sm:$0xff]   ;;  %v1769_v43 = vld [vmem:[%s2199_s1 + $0x8c] ss:$48 sps:$4 sm:$0xff]  }
  0x3b   : > { %714 = vmatprep.subr.bf16.mxu0 %v1730_v17  ;;  %757 = vmatprep.subr.bf16.mxu1 %v1733_v18  ;;  %v1764_v44 = vld [vmem:[%s2199_s1 + $0x80] ss:$48 sps:$4 sm:$0xff]   ;;  %v1767_v45 = vld [vmem:[%s2199_s1 + $0x88] ss:$48 sps:$4 sm:$0xff]   ;;  %v1772_v46 = vld [vmem:[%s2199_s1 + $0x24] ss:$48 sps:$4 sm:$0xff]  }
  0x3c   : > { %v1775_v47 = vld [vmem:[%s2199_s1 + $0x2c] ss:$48 sps:$4 sm:$0xff]   ;;  %v1770_v48 = vld [vmem:[%s2199_s1 + $0x20] ss:$48 sps:$4 sm:$0xff]   ;;  %v1773_v49 = vld [vmem:[%s2199_s1 + $0x28] ss:$48 sps:$4 sm:$0xff]  }
  0x3d   : > { %1579 = vmatmul.mubr.msk.bf16.vlgmr.msra.gmra.mxu0 %vm616_vm0, %v2010_v19  ;;  %1580 = vmatmul.mubr.msk.bf16.vlgmr.msra.gmra.mxu1 %vm616_vm0, %v2010_v19  ;;  %s1528_s20 = sshll.u32 %s2211_s27, 3  ;;  %vm1388_vm2 = vcmask 16384   ;;  %vm1404_vm3 = vcmask 23552  }
  0x3e   : > { %715 = vmatpush1.bf16.msra.mxu0 %v1728_v20  ;;  %758 = vmatpush1.bf16.msra.mxu1 %v1731_v21  ;;  %s319_s23 = scalar_lea.vmem %s2205_s7, %s1528_s20  ;;  %s315_s26 = scalar_lea.vmem %s2204_s6, %s1528_s20 }
  0x3f   : > { %716 = vmatprep.subr.bf16.mxu0 %v1736_v22  ;;  %759 = vmatprep.subr.bf16.mxu1 %v1739_v23  ;;  %v1776_v23 = vld [vmem:[#allocation2] sm:$0xff]  }
  0x40   : > { %738 = vmatprep.mubr.bf16.mxu0 %v1858_v0  ;;  %781 = vmatprep.mubr.bf16.mxu1 %v1858_v0 }
  0x42   : > { %717 = vmatpush1.bf16.msra.mxu0 %v1734_v24  ;;  %760 = vmatpush1.bf16.msra.mxu1 %v1737_v25  ;;  %v1777_v24 = vld [vmem:[#allocation2 + $0x8] sm:$0xff]   ;;  %v1778_v25 = vld [vmem:[#allocation2 + $0x10] sm:$0xff]  }
  0x43   : > { %718 = vmatprep.subr.bf16.mxu0 %v1742_v26  ;;  %761 = vmatprep.subr.bf16.mxu1 %v1745_v27  ;;  %v1779_v26 = vld [vmem:[#allocation2 + $0x18] sm:$0xff]  }
  0x44   : > { %v1214_v27 = vld [vmem:[#allocation4 + $0xf8] sm:$0xff] }
  0x46   : > { %719 = vmatpush1.bf16.msra.mxu0 %v1740_v28  ;;  %762 = vmatpush1.bf16.msra.mxu1 %v1743_v29  ;;  %v1246_v28 = vld [vmem:[#allocation4 + $0x1f8] sm:$0xff] }
  0x47   : > { %720 = vmatprep.subr.bf16.mxu0 %v1748_v30  ;;  %763 = vmatprep.subr.bf16.mxu1 %v1751_v31  ;;  %v1198_v29 = vld [vmem:[#allocation4 + $0x78] sm:$0xff]  ;;  %v1213_v31 = vld [vmem:[#allocation4 + $0xf0] sm:$0xff] }
  0x48   : > { %v1230_v30 = vld [vmem:[#allocation4 + $0x178] sm:$0xff] }
  0x4a   : > { %721 = vmatpush1.bf16.msra.mxu0 %v1746_v32  ;;  %764 = vmatpush1.bf16.msra.mxu1 %v1749_v33  ;;  %v1245_v32 = vld [vmem:[#allocation4 + $0x1f0] sm:$0xff] }
  0x4b   : > { %800 = vmatprep.subr.bf16.mxu0 %v1754_v34  ;;  %843 = vmatprep.subr.bf16.mxu1 %v1757_v35  ;;  %v1197_v33 = vld [vmem:[#allocation4 + $0x70] sm:$0xff]  ;;  %v1244_v35 = vld [vmem:[#allocation4 + $0x1e8] sm:$0xff] }
  0x4c   : > { %v1229_v34 = vld [vmem:[#allocation4 + $0x170] sm:$0xff] }
  0x4d   : > { %1581 = vmatmul.mubr.msk.bf16.vlgmr.msra.gmra.mxu0 %vm616_vm0, %v2010_v19  ;;  %1582 = vmatmul.mubr.msk.bf16.vlgmr.msra.gmra.mxu1 %vm616_vm0, %v2010_v19 }
  0x4e   : > { %801 = vmatpush1.bf16.msra.mxu0 %v1752_v36  ;;  %844 = vmatpush1.bf16.msra.mxu1 %v1755_v37  ;;  %v1196_v36 = vld [vmem:[#allocation4 + $0x68] sm:$0xff] }
  0x4f   : > { %802 = vmatprep.subr.bf16.mxu0 %v1760_v38  ;;  %845 = vmatprep.subr.bf16.mxu1 %v1763_v39  ;;  %v1228_v37 = vld [vmem:[#allocation4 + $0x168] sm:$0xff]  ;;  %v1211_v38 = vld [vmem:[#allocation4 + $0xe0] sm:$0xff] }
  0x50   : > { %824 = vmatprep.mubr.bf16.mxu0 %v1858_v0  ;;  %867 = vmatprep.mubr.bf16.mxu1 %v1858_v0  ;;  %v1243_v39 = vld [vmem:[#allocation4 + $0x1e0] sm:$0xff] }
  0x52   : > { %803 = vmatpush1.bf16.msra.mxu0 %v1758_v40  ;;  %846 = vmatpush1.bf16.msra.mxu1 %v1761_v41  ;;  %v1195_v40 = vld [vmem:[#allocation4 + $0x60] sm:$0xff] }
  0x53   : > { %804 = vmatprep.subr.bf16.mxu0 %v1766_v42  ;;  %847 = vmatprep.subr.bf16.mxu1 %v1769_v43  ;;  %v1227_v41 = vld [vmem:[#allocation4 + $0x160] sm:$0xff]  ;;  %v1210_v42 = vld [vmem:[#allocation4 + $0xd8] sm:$0xff] }
  0x54   : > { %v1242_v43 = vld [vmem:[#allocation4 + $0x1d8] sm:$0xff] }
  0x56   : > { %805 = vmatpush1.bf16.msra.mxu0 %v1764_v44  ;;  %848 = vmatpush1.bf16.msra.mxu1 %v1767_v45  ;;  %v1194_v44 = vld [vmem:[#allocation4 + $0x58] sm:$0xff] }
  0x57   : > { %806 = vmatprep.subr.bf16.mxu0 %v1772_v46  ;;  %849 = vmatprep.subr.bf16.mxu1 %v1775_v47  ;;  %v1226_v45 = vld [vmem:[#allocation4 + $0x158] sm:$0xff]  ;;  %v1209_v46 = vld [vmem:[#allocation4 + $0xd0] sm:$0xff] }
  0x58   : > { %v1241_v47 = vld [vmem:[#allocation4 + $0x1d0] sm:$0xff] }
  0x5a   : > { %807 = vmatpush1.bf16.msra.mxu0 %v1770_v48  ;;  %850 = vmatpush1.bf16.msra.mxu1 %v1773_v49  ;;  %v1193_v48 = vld [vmem:[#allocation4 + $0x50] sm:$0xff] }
  0x5b   : > { %v1225_v49 = vld [vmem:[#allocation4 + $0x150] sm:$0xff] }
  0x5d   : > { %1583 = vmatmul.mubr.msk.bf16.vlgmr.msra.gmra.mxu0 %vm616_vm0, %v2010_v19  ;;  %1584 = vmatmul.mubr.msk.bf16.vlgmr.msra.gmra.mxu1 %vm616_vm0, %v2010_v19 }
  0x5e   : > { %985 = vmatprep.mubr.bf16.mxu0 %v1858_v0  ;;  %1058 = vmatprep.mubr.bf16.mxu1 %v1858_v0 }
  0xfd   : > { %v654_v50 = vpop.f32.mrf.mxu0  ;;  %v697_v51 = vpop.f32.mrf.mxu1 }
  0xff   : > { %v656_v52 = vpop.f32.mrf.mxu0  ;;  %v699_v53 = vpop.f32.mrf.mxu1 }
 0x101   : > { %v658_v54 = vpop.f32.mrf.mxu0  ;;  %v701_v55 = vpop.f32.mrf.mxu1 }
 0x102   : > { %v878_v21 = vpack.c.bf16 %v658_v54, %v654_v50  ;;  %v880_v22 = vpack.c.bf16 %v701_v55, %v697_v51  ;;  %v1208_v50 = vld [vmem:[#allocation4 + $0xc8] sm:$0xff]  ;;  %v1207_v54 = vld [vmem:[#allocation4 + $0xc0] sm:$0xff] }
 0x103   : > { %v660_v56 = vpop.f32.mrf.mxu0  ;;  %v703_v57 = vpop.f32.mrf.mxu1  ;;  %v1240_v51 = vld [vmem:[#allocation4 + $0x1c8] sm:$0xff]  ;;  %v1239_v55 = vld [vmem:[#allocation4 + $0x1c0] sm:$0xff] }
 0x104   : > { %v879_v19 = vpack.c.bf16 %v660_v56, %v656_v52  ;;  %v881_v20 = vpack.c.bf16 %v703_v57, %v699_v53  ;;  %v1192_v52 = vld [vmem:[#allocation4 + $0x48] sm:$0xff]  ;;  %v1191_v56 = vld [vmem:[#allocation4 + $0x40] sm:$0xff] }
 0x105   : > { %v1224_v53 = vld [vmem:[#allocation4 + $0x148] sm:$0xff]  ;;  %v1223_v57 = vld [vmem:[#allocation4 + $0x140] sm:$0xff] }
 0x10d   : > { %v740_v58 = vpop.f32.mrf.mxu0  ;;  %v783_v59 = vpop.f32.mrf.mxu1 }
 0x10f   : > { %v742_v60 = vpop.f32.mrf.mxu0  ;;  %v785_v61 = vpop.f32.mrf.mxu1 }
 0x111   : > { %v744_v62 = vpop.f32.mrf.mxu0  ;;  %v787_v63 = vpop.f32.mrf.mxu1 }
 0x112   : > { %v882_v17 = vpack.c.bf16 %v744_v62, %v740_v58  ;;  %v884_v18 = vpack.c.bf16 %v787_v63, %v783_v59  ;;  %v1206_v58 = vld [vmem:[#allocation4 + $0xb8] sm:$0xff]  ;;  %v1205_v62 = vld [vmem:[#allocation4 + $0xb0] sm:$0xff] }
 0x113   : > { %v746_v1 = vpop.f32.mrf.mxu0  ;;  %v789_v2 = vpop.f32.mrf.mxu1  ;;  %v1238_v59 = vld [vmem:[#allocation4 + $0x1b8] sm:$0xff]  ;;  %v1237_v63 = vld [vmem:[#allocation4 + $0x1b0] sm:$0xff] }
 0x114   : > { %v883_v15 = vpack.c.bf16 %v746_v1, %v742_v60  ;;  %v885_v16 = vpack.c.bf16 %v789_v2, %v785_v61  ;;  %v1190_v60 = vld [vmem:[#allocation4 + $0x38] sm:$0xff]  ;;  %v1189_v1 = vld [vmem:[#allocation4 + $0x30] sm:$0xff] }
 0x115   : > { %v1222_v61 = vld [vmem:[#allocation4 + $0x138] sm:$0xff]  ;;  %v1221_v2 = vld [vmem:[#allocation4 + $0x130] sm:$0xff] }
 0x11d   : > { %v826_v3 = vpop.f32.mrf.mxu0  ;;  %v869_v4 = vpop.f32.mrf.mxu1 }
 0x11f   : > { %v828_v5 = vpop.f32.mrf.mxu0  ;;  %v871_v6 = vpop.f32.mrf.mxu1 }
 0x121   : > { %v830_v7 = vpop.f32.mrf.mxu0  ;;  %v873_v8 = vpop.f32.mrf.mxu1 }
 0x122   : > { %v886_v13 = vpack.c.bf16 %v830_v7, %v826_v3  ;;  %v888_v14 = vpack.c.bf16 %v873_v8, %v869_v4  ;;  %v1204_v3 = vld [vmem:[#allocation4 + $0xa8] sm:$0xff]  ;;  %v1203_v7 = vld [vmem:[#allocation4 + $0xa0] sm:$0xff] }
 0x123   : > { %v832_v9 = vpop.f32.mrf.mxu0  ;;  %v875_v10 = vpop.f32.mrf.mxu1  ;;  %v1236_v4 = vld [vmem:[#allocation4 + $0x1a8] sm:$0xff]  ;;  %v1235_v8 = vld [vmem:[#allocation4 + $0x1a0] sm:$0xff] }
 0x124   : > { %v887_v11 = vpack.c.bf16 %v832_v9, %v828_v5  ;;  %v889_v12 = vpack.c.bf16 %v875_v10, %v871_v6  ;;  %v1188_v5 = vld [vmem:[#allocation4 + $0x28] sm:$0xff]  ;;  %v1187_v9 = vld [vmem:[#allocation4 + $0x20] sm:$0xff] }
 0x125   : > { %v1220_v6 = vld [vmem:[#allocation4 + $0x128] sm:$0xff]  ;;  %v1219_v10 = vld [vmem:[#allocation4 + $0x120] sm:$0xff] }
 0x126   : > { %963 = vmatprep.subr.bf16.mxu0 %v887_v11  ;;  %1036 = vmatprep.subr.bf16.mxu1 %v889_v12  ;;  %v1202_v11 = vld [vmem:[#allocation4 + $0x98] sm:$0xff] }
 0x127   : > { %964 = vmatpush1.bf16.msra.mxu0 %v886_v13  ;;  %1037 = vmatpush1.bf16.msra.mxu1 %v888_v14  ;;  %v1234_v12 = vld [vmem:[#allocation4 + $0x198] sm:$0xff] }
 0x128   : > { %965 = vmatprep.subr.bf16.mxu0 %v883_v15  ;;  %1038 = vmatprep.subr.bf16.mxu1 %v885_v16  ;;  %v1186_v13 = vld [vmem:[#allocation4 + $0x18] sm:$0xff]  ;;  %v1201_v15 = vld [vmem:[#allocation4 + $0x90] sm:$0xff] }
 0x129   : > { %v1218_v14 = vld [vmem:[#allocation4 + $0x118] sm:$0xff]  ;;  %v1233_v16 = vld [vmem:[#allocation4 + $0x190] sm:$0xff] }
 0x12b   : > { %966 = vmatpush1.bf16.msra.mxu0 %v882_v17  ;;  %1039 = vmatpush1.bf16.msra.mxu1 %v884_v18  ;;  %v1185_v17 = vld [vmem:[#allocation4 + $0x10] sm:$0xff]  ;;  %v1200_v18 = vld [vmem:[#allocation4 + $0x88] sm:$0xff] }
 0x12c   : > { %967 = vmatprep.subr.bf16.mxu0 %v879_v19  ;;  %1040 = vmatprep.subr.bf16.mxu1 %v881_v20  ;;  %v1217_v19 = vld [vmem:[#allocation4 + $0x110] sm:$0xff]  ;;  %v1184_v20 = vld [vmem:[#allocation4 + $0x8] sm:$0xff] }
 0x12f   : > { %968 = vmatpush1.bf16.msra.mxu0 %v878_v21  ;;  %1041 = vmatpush1.bf16.msra.mxu1 %v880_v22  ;;  %v1232_v21 = vld [vmem:[#allocation4 + $0x188] sm:$0xff]  ;;  %v1199_v22 = vld [vmem:[#allocation4 + $0x80] sm:$0xff] }
 0x130   : > { %1599 = vmatprep.subr.mxu0 %v1214_v27  ;;  %1634 = vmatprep.subr.mxu1 %v1246_v28  ;;  %v900_v27 = vlaneseq }
 0x132   : > { %1589 = vmatmul.mubr.msk.bf16.vlgmr.msra.gmra.mxu0 %vm940_vm1, %v1776_v23  ;;  %1593 = vmatmul.mubr.msk.bf16.vlgmr.msra.gmra.mxu1 %vm940_vm1, %v1776_v23  ;;  %v1216_v23 = vld [vmem:[#allocation4 + $0x108] sm:$0xff]  ;;  %v901_v28 = vshrl.u32 %v900_v27, 7 }
 0x133   : > { %995 = vmatprep.mubr.bf16.mxu0 %v1858_v0  ;;  %1068 = vmatprep.mubr.bf16.mxu1 %v1858_v0 }
 0x134   : > { %1600 = vmatpush3.msra.mxu0 %v1198_v29  ;;  %1635 = vmatpush3.msra.mxu1 %v1230_v30 }
 0x135   : > { %1601 = vmatprep.subr.mxu0 %v1213_v31  ;;  %1636 = vmatprep.subr.mxu1 %v1245_v32  ;;  %v2134_v31 = vsub.s32 0, %v901_v28  ;;  %v910_v32 = vsub.s32 2, %v901_v28 }
 0x136   : > { %1602 = vmatpush3.msra.mxu0 %v1197_v33  ;;  %1637 = vmatpush3.msra.mxu1 %v1229_v34 }
 0x137   : > { %1638 = vmatprep.subr.mxu1 %v1244_v35  ;;  %v906_v35 = vsub.s32 1, %v901_v28 }
 0x138   : > { %1639 = vmatpush3.msra.mxu1 %v1228_v37 }
 0x139   : > { %1640 = vmatprep.subr.mxu1 %v1243_v39 }
 0x13a   : > { %1590 = vmatmul.mubr.msk.bf16.gmra.mxu0 %vm940_vm1, %v1777_v24  ;;  %1594 = vmatmul.mubr.msk.bf16.gmra.mxu1 %vm940_vm1, %v1777_v24  ;;  %v1183_v24 = vld [vmem:[#allocation4] sm:$0xff] }
 0x13b   : > { %1005 = vmatprep.mubr.bf16.mxu0 %v1858_v0  ;;  %1078 = vmatprep.mubr.bf16.mxu1 %v1858_v0 }
 0x13c   : > { %1641 = vmatpush3.msra.mxu1 %v1227_v41 }
 0x13d   : > { %1642 = vmatprep.subr.mxu1 %v1242_v43 }
 0x13e   : > { %1643 = vmatpush3.msra.mxu1 %v1226_v45 }
 0x13f   : > { %1644 = vmatprep.subr.mxu1 %v1241_v47 }
 0x140   : > { %1645 = vmatpush3.msra.mxu1 %v1225_v49 }
 0x141   : > { %1646 = vmatprep.subr.mxu1 %v1240_v51 }
 0x142   : > { %1591 = vmatmul.mubr.msk.bf16.gmra.mxu0 %vm940_vm1, %v1778_v25  ;;  %1595 = vmatmul.mubr.msk.bf16.gmra.mxu1 %vm940_vm1, %v1778_v25  ;;  %v1231_v25 = vld [vmem:[#allocation4 + $0x180] sm:$0xff] }
 0x143   : > { %1015 = vmatprep.mubr.bf16.mxu0 %v1858_v0  ;;  %1088 = vmatprep.mubr.bf16.mxu1 %v1858_v0  ;;  %v1212_v0 = vld [vmem:[#allocation4 + $0xe8] sm:$0xff] }
 0x144   : > { %1603 = vmatprep.subr.mxu0 %v1212_v0  ;;  %1647 = vmatpush3.msra.mxu1 %v1224_v53  ;;  %v898_v0 = vld [vmem:[%s2201_s3] sm:$0xf] }
 0x145   : > { %1604 = vmatpush3.msra.mxu0 %v1196_v36  ;;  %1648 = vmatprep.subr.mxu1 %v1239_v55  ;;  %v914_v36 = vsub.s32 3, %v901_v28  ;;  %v2140_v39 = vrot.slane %v898_v0, %v2134_v31  ;;  %v2144_v43 = vrot.slane %v898_v0, %v906_v35 }
 0x146   : > { %1605 = vmatprep.subr.mxu0 %v1211_v38  ;;  %1649 = vmatpush3.msra.mxu1 %v1223_v57 }
 0x147   : > { %1606 = vmatpush3.msra.mxu0 %v1195_v40  ;;  %1650 = vmatprep.subr.mxu1 %v1238_v59  ;;  %v2142_v40 = vrot.slane %v898_v0, %v910_v32 }
 0x148   : > { %1607 = vmatprep.subr.mxu0 %v1210_v42  ;;  %1651 = vmatpush3.msra.mxu1 %v1222_v61 }
 0x149   : > { %1608 = vmatpush3.msra.mxu0 %v1194_v44  ;;  %1652 = vmatprep.subr.mxu1 %v1237_v63  ;;  %v2146_v44 = vrot.slane %v898_v0, %v914_v36 }
 0x14a   : > { %1592 = vmatmul.mubr.msk.bf16.gmra.mxu0 %vm940_vm1, %v1779_v26  ;;  %1596 = vmatmul.mubr.msk.bf16.gmra.mxu1 %vm940_vm1, %v1779_v26  ;;  %v1215_v26 = vld [vmem:[#allocation4 + $0x100] sm:$0xff] }
 0x14b   : > { %1609 = vmatprep.subr.mxu0 %v1209_v46  ;;  %1653 = vmatpush3.msra.mxu1 %v1221_v2 }
 0x14c   : > { %1610 = vmatpush3.msra.mxu0 %v1193_v48  ;;  %1654 = vmatprep.subr.mxu1 %v1236_v4 }
 0x14d   : > { %1611 = vmatprep.subr.mxu0 %v1208_v50  ;;  %1655 = vmatpush3.msra.mxu1 %v1220_v6 }
 0x14e   : > { %1612 = vmatpush3.msra.mxu0 %v1192_v52  ;;  %1656 = vmatprep.subr.mxu1 %v1235_v8 }
 0x14f   : > { %1613 = vmatprep.subr.mxu0 %v1207_v54  ;;  %1657 = vmatpush3.msra.mxu1 %v1219_v10 }
 0x150   : > { %1614 = vmatpush3.msra.mxu0 %v1191_v56  ;;  %1658 = vmatprep.subr.mxu1 %v1234_v12 }
 0x151   : > { %1615 = vmatprep.subr.mxu0 %v1206_v58  ;;  %1659 = vmatpush3.msra.mxu1 %v1218_v14 }
 0x152   : > { %1616 = vmatpush3.msra.mxu0 %v1190_v60  ;;  %1660 = vmatprep.subr.mxu1 %v1233_v16 }
 0x153   : > { %1617 = vmatprep.subr.mxu0 %v1205_v62  ;;  %1661 = vmatpush3.msra.mxu1 %v1217_v19 }
 0x154   : > { %1618 = vmatpush3.msra.mxu0 %v1189_v1  ;;  %1662 = vmatprep.subr.mxu1 %v1232_v21 }
 0x155   : > { %1619 = vmatprep.subr.mxu0 %v1204_v3  ;;  %1663 = vmatpush3.msra.mxu1 %v1216_v23 }
 0x156   : > { %1620 = vmatpush3.msra.mxu0 %v1188_v5  ;;  %1664 = vmatprep.subr.mxu1 %v1231_v25 }
 0x157   : > { %1621 = vmatprep.subr.mxu0 %v1203_v7  ;;  %1665 = vmatpush3.msra.mxu1 %v1215_v26 }
 0x158   : > { %1622 = vmatpush3.msra.mxu0 %v1187_v9 }
 0x159   : > { %1623 = vmatprep.subr.mxu0 %v1202_v11 }
 0x15a   : > { %1624 = vmatpush3.msra.mxu0 %v1186_v13 }
 0x15b   : > { %1625 = vmatprep.subr.mxu0 %v1201_v15 }
 0x15c   : > { %1626 = vmatpush3.msra.mxu0 %v1185_v17 }
 0x15d   : > { %1627 = vmatprep.subr.mxu0 %v1200_v18 }
 0x15e   : > { %1628 = vmatpush3.msra.mxu0 %v1184_v20 }
 0x15f   : > { %1629 = vmatprep.subr.mxu0 %v1199_v22 }
 0x160   : > { %1630 = vmatpush3.msra.mxu0 %v1183_v24 }
 0x1f2   : > { %v987_v29 = vpop.f32.mrf.mxu0  ;;  %v1060_v30 = vpop.f32.mrf.mxu1 }
 0x1f3   : > { %v988_v49 = vadd.f32 %v987_v29, %v2140_v39  ;;  %v1061_v50 = vadd.f32 %v1060_v30, %v2142_v40 }
 0x1f4   : > { %v989_v33 = vpop.f32.mrf.mxu0  ;;  %v1062_v34 = vpop.f32.mrf.mxu1 }
 0x1f5   : > { %v990_v55 = vadd.f32 %v989_v33, %v2144_v43  ;;  %v1063_v56 = vadd.f32 %v1062_v34, %v2146_v44  ;;  %v1099_v4 = vmax.f32 %v988_v49, 0.0  ;;  %v1101_v5 = vmax.f32 %v1061_v50, 0.0 }
 0x1f6   : > { %v991_v37 = vpop.f32.mrf.mxu0  ;;  %v1064_v38 = vpop.f32.mrf.mxu1 }
 0x1f7   : > { %v992_v45 = vadd.f32 %v991_v37, %v2140_v39  ;;  %v1065_v46 = vadd.f32 %v1064_v38, %v2142_v40  ;;  %v1100_v10 = vmax.f32 %v990_v55, 0.0  ;;  %v1102_v11 = vmax.f32 %v1063_v56, 0.0 }
 0x1f8   : > { %v993_v41 = vpop.f32.mrf.mxu0  ;;  %v1066_v42 = vpop.f32.mrf.mxu1 }
 0x1f9   : > { %v994_v51 = vadd.f32 %v993_v41, %v2144_v43  ;;  %v1067_v52 = vadd.f32 %v1066_v42, %v2146_v44  ;;  %v1103_v59 = vmax.f32 %v992_v45, 0.0  ;;  %v1105_v60 = vmax.f32 %v1065_v46, 0.0 }
 0x1fa   : > { %v997_v47 = vpop.f32.mrf.mxu0  ;;  %v1070_v48 = vpop.f32.mrf.mxu1 }
 0x1fb   : > { %v998_v57 = vadd.f32 %v997_v47, %v2140_v39  ;;  %v1071_v58 = vadd.f32 %v1070_v48, %v2142_v40  ;;  %v1104_v6 = vmax.f32 %v994_v51, 0.0  ;;  %v1106_v7 = vmax.f32 %v1067_v52, 0.0 }
 0x1fc   : > { %v999_v53 = vpop.f32.mrf.mxu0  ;;  %v1072_v54 = vpop.f32.mrf.mxu1  ;;  %v1131_v14 = vadd.f32 %v1103_v59, %v1099_v4  ;;  %v1157_v15 = vadd.f32 %v1105_v60, %v1101_v5 }
 0x1fd   : > { %v1000_v63 = vadd.f32 %v999_v53, %v2144_v43  ;;  %v1073_v1 = vadd.f32 %v1072_v54, %v2146_v44  ;;  %v1107_v12 = vmax.f32 %v998_v57, 0.0  ;;  %v1109_v13 = vmax.f32 %v1071_v58, 0.0 }
 0x1fe   : > { %v1001_v61 = vpop.f32.mrf.mxu0  ;;  %v1074_v62 = vpop.f32.mrf.mxu1  ;;  %v1144_v24 = vadd.f32 %v1104_v6, %v1100_v10  ;;  %v1170_v25 = vadd.f32 %v1106_v7, %v1102_v11 }
 0x1ff   : > { %v1002_v2 = vadd.f32 %v1001_v61, %v2140_v39  ;;  %v1075_v3 = vadd.f32 %v1074_v62, %v2142_v40  ;;  %v1108_v20 = vmax.f32 %v1000_v63, 0.0  ;;  %v1110_v21 = vmax.f32 %v1073_v1, 0.0 }
 0x200   : > { %v1003_v8 = vpop.f32.mrf.mxu0  ;;  %v1076_v9 = vpop.f32.mrf.mxu1  ;;  %v1132_v30 = vadd.f32 %v1131_v14, %v1107_v12  ;;  %v1158_v32 = vadd.f32 %v1157_v15, %v1109_v13 }
 0x201   : > { %v1004_v16 = vadd.f32 %v1003_v8, %v2144_v43  ;;  %v1077_v17 = vadd.f32 %v1076_v9, %v2146_v44  ;;  %v1111_v22 = vmax.f32 %v1002_v2, 0.0  ;;  %v1113_v23 = vmax.f32 %v1075_v3, 0.0 }
 0x202   : > { %v1007_v18 = vpop.f32.mrf.mxu0  ;;  %v1080_v19 = vpop.f32.mrf.mxu1  ;;  %v1145_v38 = vadd.f32 %v1144_v24, %v1108_v20  ;;  %v1171_v41 = vadd.f32 %v1170_v25, %v1110_v21 }
 0x203   : > { %v1008_v26 = vadd.f32 %v1007_v18, %v2140_v39  ;;  %v1081_v27 = vadd.f32 %v1080_v19, %v2142_v40  ;;  %v1112_v0 = vmax.f32 %v1004_v16, 0.0  ;;  %v1114_v35 = vmax.f32 %v1077_v17, 0.0 }
 0x204   : > { %v1009_v28 = vpop.f32.mrf.mxu0  ;;  %v1082_v29 = vpop.f32.mrf.mxu1  ;;  %v1133_v42 = vadd.f32 %v1132_v30, %v1111_v22  ;;  %v1159_v45 = vadd.f32 %v1158_v32, %v1113_v23 }
 0x205   : > { %v1010_v33 = vadd.f32 %v1009_v28, %v2144_v43  ;;  %v1083_v34 = vadd.f32 %v1082_v29, %v2146_v44  ;;  %v1115_v46 = vmax.f32 %v1008_v26, 0.0  ;;  %v1117_v47 = vmax.f32 %v1081_v27, 0.0 }
 0x206   : > { %v1011_v36 = vpop.f32.mrf.mxu0  ;;  %v1084_v37 = vpop.f32.mrf.mxu1  ;;  %v1146_v56 = vadd.f32 %v1145_v38, %v1112_v0  ;;  %v1172_v57 = vadd.f32 %v1171_v41, %v1114_v35 }
 0x207   : > { %v1012_v48 = vadd.f32 %v1011_v36, %v2140_v39  ;;  %v1085_v49 = vadd.f32 %v1084_v37, %v2142_v40  ;;  %v1116_v52 = vmax.f32 %v1010_v33, 0.0  ;;  %v1118_v53 = vmax.f32 %v1083_v34, 0.0 }
 0x208   : > { %v1013_v50 = vpop.f32.mrf.mxu0  ;;  %v1086_v51 = vpop.f32.mrf.mxu1  ;;  %v1134_v3 = vadd.f32 %v1133_v42, %v1115_v46  ;;  %v1160_v4 = vadd.f32 %v1159_v45, %v1117_v47 }
 0x209   : > { %v1014_v54 = vadd.f32 %v1013_v50, %v2144_v43  ;;  %v1087_v55 = vadd.f32 %v1086_v51, %v2146_v44  ;;  %v1119_v58 = vmax.f32 %v1012_v48, 0.0  ;;  %v1121_v59 = vmax.f32 %v1085_v49, 0.0 }
 0x20a   : > { %v1017_v60 = vpop.f32.mrf.mxu0  ;;  %v1090_v61 = vpop.f32.mrf.mxu1  ;;  %v1147_v7 = vadd.f32 %v1146_v56, %v1116_v52  ;;  %v1173_v8 = vadd.f32 %v1172_v57, %v1118_v53 }
 0x20b   : > { %v1120_v62 = vmax.f32 %v1014_v54, 0.0  ;;  %v1122_v63 = vmax.f32 %v1087_v55, 0.0  ;;  %v1018_v1 = vadd.f32 %v1017_v60, %v2140_v39  ;;  %v1091_v2 = vadd.f32 %v1090_v61, %v2142_v40 }
 0x20c   : > { %v1019_v5 = vpop.f32.mrf.mxu0  ;;  %v1092_v6 = vpop.f32.mrf.mxu1  ;;  %v1135_v11 = vadd.f32 %v1134_v3, %v1119_v58  ;;  %v1161_v12 = vadd.f32 %v1160_v4, %v1121_v59 }
 0x20d   : > { %v1123_v9 = vmax.f32 %v1018_v1, 0.0  ;;  %v1125_v10 = vmax.f32 %v1091_v2, 0.0  ;;  %v1020_v13 = vadd.f32 %v1019_v5, %v2144_v43  ;;  %v1093_v14 = vadd.f32 %v1092_v6, %v2146_v44  ;;  %v1247_v2 = vld [vmem:[%s2203_s5] sm:$0x1] }
 0x20e   : > { %v1021_v15 = vpop.f32.mrf.mxu0  ;;  %v1094_v16 = vpop.f32.mrf.mxu1  ;;  %v1148_v17 = vadd.f32 %v1147_v7, %v1120_v62  ;;  %v1174_v18 = vadd.f32 %v1173_v8, %v1122_v63 }
 0x20f   : > { %v1022_v19 = vadd.f32 %v1021_v15, %v2140_v39  ;;  %v1095_v20 = vadd.f32 %v1094_v16, %v2142_v40  ;;  %v1136_v21 = vadd.f32 %v1135_v11, %v1123_v9  ;;  %v1162_v22 = vadd.f32 %v1161_v12, %v1125_v10 }
 0x210   : > { %v1124_v23 = vmax.f32 %v1020_v13, 0.0  ;;  %v1126_v24 = vmax.f32 %v1093_v14, 0.0  ;;  %v1023_v25 = vpop.f32.mrf.mxu0  ;;  %v1096_v26 = vpop.f32.mrf.mxu1 }
 0x211   : > { %v1127_v27 = vmax.f32 %v1022_v19, 0.0  ;;  %v1129_v28 = vmax.f32 %v1095_v20, 0.0  ;;  %v1024_v29 = vadd.f32 %v1023_v25, %v2144_v43  ;;  %v1097_v30 = vadd.f32 %v1096_v26, %v2146_v44 }
 0x212   : > { %v1149_v32 = vadd.f32 %v1148_v17, %v1124_v23  ;;  %v1175_v33 = vadd.f32 %v1174_v18, %v1126_v24 }
 0x213   : > { %v1137_v34 = vadd.f32 %v1136_v21, %v1127_v27  ;;  %v1163_v0 = vadd.f32 %v1162_v22, %v1129_v28  ;;  %v1128_v35 = vmax.f32 %v1024_v29, 0.0  ;;  %v1130_v39 = vmax.f32 %v1097_v30, 0.0 }
 0x215   : > { %v1138_v36 = vrot.slane %v1137_v34, 4  ;;  %v1164_v40 = vrot.slane %v1163_v0, 4  ;;  %v1150_v37 = vadd.f32 %v1149_v32, %v1128_v35  ;;  %v1176_v38 = vadd.f32 %v1175_v33, %v1130_v39 }
 0x217   : > { %v1139_v41 = vadd.f32 %v1138_v36, %v1137_v34  ;;  %v1165_v42 = vadd.f32 %v1164_v40, %v1163_v0  ;;  %v1151_v45 = vrot.slane %v1150_v37, 4  ;;  %v1177_v46 = vrot.slane %v1176_v38, 4 }
 0x219   : > { %v1140_v47 = vrot.slane %v1139_v41, 2  ;;  %v1166_v48 = vrot.slane %v1165_v42, 2  ;;  %v1152_v49 = vadd.f32 %v1151_v45, %v1150_v37  ;;  %v1178_v43 = vadd.f32 %v1177_v46, %v1176_v38 }
 0x21b   : > { %v1141_v50 = vadd.f32 %v1140_v47, %v1139_v41  ;;  %v1167_v44 = vadd.f32 %v1166_v48, %v1165_v42  ;;  %v1153_v51 = vrot.slane %v1152_v49, 2  ;;  %v1179_v52 = vrot.slane %v1178_v43, 2 }
 0x21d   : > { %v1154_v53 = vadd.f32 %v1153_v51, %v1152_v49  ;;  %v1180_v54 = vadd.f32 %v1179_v52, %v1178_v43  ;;  %v1142_v55 = vrot.slane %v1141_v50, 1  ;;  %v1168_v56 = vrot.slane %v1167_v44, 1 }
 0x21f   : > { %v1155_v57 = vrot.slane %v1154_v53, 1  ;;  %v1181_v58 = vrot.slane %v1180_v54, 1  ;;  %v1143_v61 = vadd.f32 %v1142_v55, %v1141_v50  ;;  %v1169_v62 = vadd.f32 %v1168_v56, %v1167_v44 }
 0x221   : > { %v1156_v59 = vadd.f32 %v1155_v57, %v1154_v53  ;;  %v1182_v60 = vadd.f32 %v1181_v58, %v1180_v54 }
 0x223   : > { %1312 = vmatprep.mubr.f32.mxu0 %v1156_v59  ;;  %1382 = vmatprep.mubr.f32.mxu1 %v1182_v60 }
 0x224   : > { %1313 = vmatmul.mubr.f32.vlgmr.msra.gmra.mxu0 %v1143_v61  ;;  %1383 = vmatmul.mubr.f32.vlgmr.msra.gmra.mxu1 %v1169_v62 }
 0x2e4   : > { %v1631_v63 = vpop.f32.mrf.mxu0  ;;  %v1666_v1 = vpop.f32.mrf.mxu1 }
 0x2e6   : > { %v1632_v3 = vpop.f32.mrf.mxu0  ;;  %v1667_v4 = vpop.f32.mrf.mxu1 }
 0x2e7   : > { %v1633_v5 = vadd.f32 %v1632_v3, %v1631_v63  ;;  %v1668_v7 = vadd.f32 %v1667_v4, %v1666_v1 }
 0x2e9   : > { %v1315_v6 = vadd.f32 %v1633_v5, %v1247_v2 }
 0x2eb   : > { %v1385_v8 = vadd.f32 %v1668_v7, %v1315_v6 }
 0x2ed   : > { %v1403_v9 = vrot.slane %v1385_v8, %v2134_v31  ;;  %v1389_v10 = vsel %vm1388_vm2, %v1385_v8, -inf }
 0x2ee   : > { %1390 = vmax.xlane.f32.xlu0 %v1389_v10 }
 0x2ef   : > { %1405 = vst.msk [vmem:[%s319_s23] sm:$0xff] %vm1404_vm3, %v1403_v9 }
 0x377   : > { %v1391_v11 = vpop.xlane.xlu0 %1390 }
 0x378   : > { %v1392_v12 = vsub.f32 %v1385_v8, %v1391_v11 }
 0x37a   : > { %v1393_v13 = vmul.f32 1.442695, %v1392_v12 }
 0x37c   : > { %1780 = vpow2.f32 %v1393_v13 }
 0x389   : > { %v1781_v14 = vpop.eup %1780 }
 0x38a   : > { %v1395_v15 = vsel %vm1388_vm2, %v1781_v14, 0.0 }
 0x38b   : > { %1396 = vadd.xlane.f32.xlu0 %v1395_v15 }
 0x414   : > { %v1397_v16 = vpop.xlane.xlu0 %1396 }
 0x415   : > { %1782 = vrcp.f32 %v1397_v16 }
 0x422   : > { %v1783_v17 = vpop.eup %1782 }
 0x423   : > { %v1399_v18 = vmul.f32 %v1783_v17, %v1781_v14 }
 0x425   : > { %v1409_v19 = vrot.slane %v1399_v18, %v2134_v31 }
 0x427   : > { %1410 = vst.msk [vmem:[%s315_s26] sm:$0xff] %vm1404_vm3, %v1409_v19 }
 0x428 PF: > { %s20_s24 = sadd.s32 1, %s1850_s24  }
 0x429   : > { %p17_p5 = scmp.ge.s32.totalorder %s20_s24, 4  }
 0x42b   :  { %19 = sbr.rel (!%p17_p5) target bundleno = 2 (0x2), region = 95 }
 0x430   :  { %1444 = vsyncpa [#allocation3], 1 }
 0x431   :  { %1446 = vsyncpa [#allocation3 + $0x1], 1 }
 0x432   :  { %1447 = vsyncpa [#allocation5], 1 }

</bundles_post_ra>
